<compile_context>
chip_gen: v5e
topology: v5e:2x2
jax: 0.10.0
libtpu: 0.0.40
codegen_flags: <defaults>
</compile_context>

<pallas_src>
import jax
import jax.numpy as jnp
from jax import lax
from jax.experimental import pallas as pl
from jax.experimental.pallas import tpu as pltpu

# Fixed binomial filter ([1,2,1] outer [1,2,1]) / 16 — matches the PyTorch buffer.
_BLUR_W = [[1.0, 2.0, 1.0],
           [2.0, 4.0, 2.0],
           [1.0, 2.0, 1.0]]
_BLUR_NORM = 16.0


def _vmem_capacity_bytes():
    """Generation-aware VMEM capacity (64 MiB on v7x, 128 MiB on v5e/v6e)."""
    try:
        info = pltpu.get_tpu_info()
        cap = getattr(info, "vmem_capacity_bytes", None)
        if cap:
            return int(cap)
    except Exception:
        pass
    return 64 << 20  # conservative (v7x)


def _vmem_need(tc, th, H, W, itemsize):
    """Conservative per-step VMEM estimate: double-buffered DMA blocks (main in,
    2 halo blocks, out) plus ~10 f32-sized in-kernel temporaries."""
    blk = tc * th * W
    halo = (2 * tc * 8 * W * itemsize) if th < H else 0
    return 2 * (2 * blk * itemsize + halo) + 10 * 4 * blk


def _pick_tiles(NC, H, W, itemsize, budget):
    """Largest (channel-chunk, H-strip) block fitting the budget; prefer >=2
    channel chunks so both TensorCores / the DMA pipeline have work."""
    th_cands = [d for d in range(H, 0, -1) if H % d == 0 and (d == H or d % 8 == 0)]
    tc_cands = [d for d in range(NC, 0, -1) if NC % d == 0]
    for prefer_multi in (True, False):
        for th in th_cands:
            for tc in tc_cands:
                if prefer_multi and NC >= 2 and NC // tc < 2:
                    continue
                if _vmem_need(tc, th, H, W, itemsize) <= budget:
                    return tc, th
    # TODO(synk): even (tc=1, smallest th) exceeds the budget (enormous W); a
    # W-tiled variant with a 1-column halo would be needed here.
    return 1, th_cands[-1]


def _make_kernel(has_halo):
    """Kernel factory: with halo refs (H-strip tiling) or without (th == H)."""

    def kernel(*args):
        if has_halo:
            x_ref, up_ref, dn_ref, o_ref = args
        else:
            x_ref, o_ref = args

        f32 = jnp.float32
        tc, th, W = x_ref.shape

        xf = x_ref[...].astype(f32)                                   # (tc, th, W)

        if has_halo:
            hb = up_ref.shape[1]
            h_idx = pl.program_id(1)
            nh = pl.num_programs(1)
            # Mask halo rows to zero at the image border.  Never turn this into a
            # program_id==0 one-time init: each core re-evaluates it per step.
            not_first = (h_idx > 0).astype(f32)
            not_last = (h_idx < nh - 1).astype(f32)
            top = up_ref[:, hb - 1:hb, :].astype(f32) * not_first      # (tc, 1, W)
            bot = dn_ref[:, 0:1, :].astype(f32) * not_last             # (tc, 1, W)
        else:
            top = jnp.zeros((tc, 1, W), f32)
            bot = jnp.zeros((tc, 1, W), f32)

        # Vertical [1,2,1]: neighbor sum via symmetric rolls along the sublane
        # (row) axis; the sum roll(+1)+roll(th-1) is independent of the roll
        # direction convention.  Fix the two wrapped rows and splice in halos.
        row = lax.broadcasted_iota(jnp.int32, (tc, th, W), 1)
        vsum = pltpu.roll(xf, shift=1, axis=1) + pltpu.roll(xf, shift=th - 1, axis=1)
        vsum = vsum + jnp.where(row == 0, top - xf[:, th - 1:th, :], 0.0)
        vsum = vsum + jnp.where(row == th - 1, bot - xf[:, 0:1, :], 0.0)
        v = vsum + 2.0 * xf                                            # (tc, th, W)

        # Horizontal [1,2,1]: same trick along the lane (W) axis, zero padding
        # outside the image, so the taps live on the XLU instead of extra VMEM
        # load/store passes.
        lane = lax.broadcasted_iota(jnp.int32, (tc, th, W), 2)
        hsum = pltpu.roll(v, shift=1, axis=2) + pltpu.roll(v, shift=W - 1, axis=2)
        hsum = hsum - jnp.where(lane == 0, v[:, :, W - 1:W], 0.0)
        hsum = hsum - jnp.where(lane == W - 1, v[:, :, 0:1], 0.0)

        o_ref[...] = ((hsum + 2.0 * v) * (1.0 / _BLUR_NORM)).astype(o_ref.dtype)

    return kernel


def blur3x3(x, *, tc=None, th=None):
    """Depthwise 3x3 binomial blur, padding=1. x: (N, C, H, W) -> (N, C, H, W)."""
    N, C, H, W = x.shape
    NC = N * C
    itemsize = jnp.dtype(x.dtype).itemsize

    cap = _vmem_capacity_bytes()
    budget = max(cap // 4, 4 << 20)

    a_tc, a_th = _pick_tiles(NC, H, W, itemsize, budget)
    tc = a_tc if tc is None else tc
    th = a_th if th is None else th
    if NC % tc != 0:
        raise ValueError(f"tc={tc} must divide N*C={NC}")
    if th != H and (H % th != 0 or th % 8 != 0):
        raise ValueError(f"th={th} must equal H or be a multiple of 8 dividing H={H}")

    nh = H // th
    grid = (NC // tc, nh)

    # Zero-cost reshape: NCHW is already (NC, H, W) contiguous; W is the lane dim.
    xr = x.reshape(NC, H, W)

    main_spec = pl.BlockSpec((tc, th, W), lambda c, h: (c, h, 0))
    out_spec = pl.BlockSpec((tc, th, W), lambda c, h: (c, h, 0))

    if nh > 1:
        # 1-row halos fetched as 8-row blocks (sublane-tile aligned) with clamped
        # block index maps; the kernel uses row 7 / row 0 of them.
        hb = 8
        tpb = th // 8          # 8-row blocks per strip
        nhb = H // 8           # total 8-row blocks
        up_spec = pl.BlockSpec((tc, hb, W),
                               lambda c, h: (c, jnp.maximum(h * tpb - 1, 0), 0))
        dn_spec = pl.BlockSpec((tc, hb, W),
                               lambda c, h: (c, jnp.minimum((h + 1) * tpb, nhb - 1), 0))
        in_specs = [main_spec, up_spec, dn_spec]
        operands = (xr, xr, xr)
        kernel = _make_kernel(True)
    else:
        in_specs = [main_spec]
        operands = (xr,)
        kernel = _make_kernel(False)

    need = _vmem_need(tc, th, H, W, itemsize)
    vmem_limit = int(min(cap - (8 << 20), max(2 * need, 16 << 20)))
    vmem_limit = max(vmem_limit, 8 << 20)

    out = pl.pallas_call(
        kernel,
        out_shape=jax.ShapeDtypeStruct((NC, H, W), x.dtype),
        grid_spec=pltpu.PrefetchScalarGridSpec(
            num_scalar_prefetch=0,
            grid=grid,
            in_specs=in_specs,
            out_specs=out_spec,
        ),
        compiler_params=pltpu.CompilerParams(
            dimension_semantics=("parallel", "parallel"),
            vmem_limit_bytes=vmem_limit,
        ),
    )(*operands)

    return out.reshape(N, C, H, W)


def _blur3x3_ref(x):
    """Pure-JAX reference (9-tap weighted sum, NCHW) for correctness check."""
    N, C, H, W = x.shape
    xp = jnp.pad(x, ((0, 0), (0, 0), (1, 1), (1, 1))).astype(jnp.float32)
    acc = jnp.zeros((N, C, H, W), jnp.float32)
    for dy in range(3):
        for dx in range(3):
            w = _BLUR_W[dy][dx] / _BLUR_NORM
            acc = acc + w * xp[:, :, dy:dy + H, dx:dx + W]
    return acc.astype(x.dtype)


if __name__ == "__main__":
    key = jax.random.PRNGKey(0)
    N, C, H, W = 2, 4, 16, 16
    x = jax.random.normal(key, (N, C, H, W), dtype=jnp.float32)

    y_ref = _blur3x3_ref(x)

    # Default auto-picked tiling (whole-image strips, >=2 channel chunks).
    y = jax.block_until_ready(blur3x3(x))
    assert y.shape == (N, C, H, W)
    assert jnp.allclose(y, y_ref, atol=1e-5, rtol=1e-5)

    # Force H-strip tiling so the halo path (interior strips + border masking)
    # is also exercised on hardware.
    y2 = jax.block_until_ready(blur3x3(x, tc=2, th=8))
    assert jnp.allclose(y2, y_ref, atol=1e-5, rtol=1e-5)

    print("KERNEL_OK")
</pallas_src>

<mosaic_0001>
module attributes {stable_mosaic.version = 11 : i64} {
  func.func @kernel(%arg0: i32, %arg1: i32, %arg2: memref<4x16x16xf32, #tpu.memory_space<vmem>>, %arg3: memref<4x16x16xf32, #tpu.memory_space<vmem>>) attributes {dimension_semantics = [#tpu.dimension_semantics<parallel>, #tpu.dimension_semantics<parallel>], iteration_bounds = array<i64: 2, 1>, scalar_prefetch = 0 : i64, scratch_operands = 0 : i64, tpu.core_type = #tpu.core_type<tc>, window_params = [{transform_indices = @transform_0, window_bounds = array<i64: 4, 16, 16>}, {transform_indices = @transform_1, window_bounds = array<i64: 4, 16, 16>}]} {
    %c0 = arith.constant 0 : index
    %c0_0 = arith.constant 0 : index
    %c0_1 = arith.constant 0 : index
    %0 = vector.load %arg2[%c0, %c0_0, %c0_1] : memref<4x16x16xf32, #tpu.memory_space<vmem>>, vector<4x16x16xf32>
    %cst = arith.constant 0.000000e+00 : f32
    %1 = vector.broadcast %cst : f32 to vector<4x1x16xf32>
    %cst_2 = arith.constant 0.000000e+00 : f32
    %2 = vector.broadcast %cst_2 : f32 to vector<4x1x16xf32>
    %3 = tpu.iota {dimensions = array<i32: 1>} : vector<4x16x16xi32>
    %c1_i32 = arith.constant 1 : i32
    %4 = tpu.dynamic_rotate %0 by %c1_i32 dim 1 : vector<4x16x16xf32>, i32 -> vector<4x16x16xf32>
    %c15_i32 = arith.constant 15 : i32
    %5 = tpu.dynamic_rotate %0 by %c15_i32 dim 1 : vector<4x16x16xf32>, i32 -> vector<4x16x16xf32>
    %6 = arith.addf %4, %5 : vector<4x16x16xf32>
    %c0_i32 = arith.constant 0 : i32
    %7 = vector.broadcast %c0_i32 : i32 to vector<4x16x16xi32>
    %8 = arith.cmpi eq, %3, %7 : vector<4x16x16xi32>
    %9 = vector.extract_strided_slice %0 {offsets = [0, 15, 0], sizes = [4, 1, 16], strides = [1, 1, 1]} : vector<4x16x16xf32> to vector<4x1x16xf32>
    %10 = arith.subf %1, %9 : vector<4x1x16xf32>
    %cst_3 = arith.constant 0.000000e+00 : f32
    %11 = vector.shape_cast %10 : vector<4x1x16xf32> to vector<4x1x16xf32>
    %12 = vector.broadcast %11 : vector<4x1x16xf32> to vector<4x16x16xf32>
    %13 = vector.broadcast %cst_3 : f32 to vector<4x16x16xf32>
    %14 = arith.select %8, %12, %13 : vector<4x16x16xi1>, vector<4x16x16xf32>
    %15 = arith.addf %6, %14 : vector<4x16x16xf32>
    %c15_i32_4 = arith.constant 15 : i32
    %16 = vector.broadcast %c15_i32_4 : i32 to vector<4x16x16xi32>
    %17 = arith.cmpi eq, %3, %16 : vector<4x16x16xi32>
    %18 = vector.extract_strided_slice %0 {offsets = [0, 0, 0], sizes = [4, 1, 16], strides = [1, 1, 1]} : vector<4x16x16xf32> to vector<4x1x16xf32>
    %19 = arith.subf %2, %18 : vector<4x1x16xf32>
    %cst_5 = arith.constant 0.000000e+00 : f32
    %20 = vector.shape_cast %19 : vector<4x1x16xf32> to vector<4x1x16xf32>
    %21 = vector.broadcast %20 : vector<4x1x16xf32> to vector<4x16x16xf32>
    %22 = vector.broadcast %cst_5 : f32 to vector<4x16x16xf32>
    %23 = arith.select %17, %21, %22 : vector<4x16x16xi1>, vector<4x16x16xf32>
    %24 = arith.addf %15, %23 : vector<4x16x16xf32>
    %cst_6 = arith.constant 2.000000e+00 : f32
    %25 = vector.broadcast %cst_6 : f32 to vector<4x16x16xf32>
    %26 = arith.mulf %25, %0 : vector<4x16x16xf32>
    %27 = arith.addf %24, %26 : vector<4x16x16xf32>
    %28 = tpu.iota {dimensions = array<i32: 2>} : vector<4x16x16xi32>
    %c1_i32_7 = arith.constant 1 : i32
    %29 = tpu.dynamic_rotate %27 by %c1_i32_7 dim 2 : vector<4x16x16xf32>, i32 -> vector<4x16x16xf32>
    %c15_i32_8 = arith.constant 15 : i32
    %30 = tpu.dynamic_rotate %27 by %c15_i32_8 dim 2 : vector<4x16x16xf32>, i32 -> vector<4x16x16xf32>
    %31 = arith.addf %29, %30 : vector<4x16x16xf32>
    %c0_i32_9 = arith.constant 0 : i32
    %32 = vector.broadcast %c0_i32_9 : i32 to vector<4x16x16xi32>
    %33 = arith.cmpi eq, %28, %32 : vector<4x16x16xi32>
    %34 = vector.extract_strided_slice %27 {offsets = [0, 0, 15], sizes = [4, 16, 1], strides = [1, 1, 1]} : vector<4x16x16xf32> to vector<4x16x1xf32>
    %cst_10 = arith.constant 0.000000e+00 : f32
    %35 = vector.shape_cast %34 : vector<4x16x1xf32> to vector<4x16x1xf32>
    %36 = vector.broadcast %35 : vector<4x16x1xf32> to vector<4x16x16xf32>
    %37 = vector.broadcast %cst_10 : f32 to vector<4x16x16xf32>
    %38 = arith.select %33, %36, %37 : vector<4x16x16xi1>, vector<4x16x16xf32>
    %39 = arith.subf %31, %38 : vector<4x16x16xf32>
    %c15_i32_11 = arith.constant 15 : i32
    %40 = vector.broadcast %c15_i32_11 : i32 to vector<4x16x16xi32>
    %41 = arith.cmpi eq, %28, %40 : vector<4x16x16xi32>
    %42 = vector.extract_strided_slice %27 {offsets = [0, 0, 0], sizes = [4, 16, 1], strides = [1, 1, 1]} : vector<4x16x16xf32> to vector<4x16x1xf32>
    %cst_12 = arith.constant 0.000000e+00 : f32
    %43 = vector.shape_cast %42 : vector<4x16x1xf32> to vector<4x16x1xf32>
    %44 = vector.broadcast %43 : vector<4x16x1xf32> to vector<4x16x16xf32>
    %45 = vector.broadcast %cst_12 : f32 to vector<4x16x16xf32>
    %46 = arith.select %41, %44, %45 : vector<4x16x16xi1>, vector<4x16x16xf32>
    %47 = arith.subf %39, %46 : vector<4x16x16xf32>
    %cst_13 = arith.constant 2.000000e+00 : f32
    %48 = vector.broadcast %cst_13 : f32 to vector<4x16x16xf32>
    %49 = arith.mulf %48, %27 : vector<4x16x16xf32>
    %50 = arith.addf %47, %49 : vector<4x16x16xf32>
    %cst_14 = arith.constant 6.250000e-02 : f32
    %51 = vector.broadcast %cst_14 : f32 to vector<4x16x16xf32>
    %52 = arith.mulf %50, %51 : vector<4x16x16xf32>
    %c0_15 = arith.constant 0 : index
    %c0_16 = arith.constant 0 : index
    %c0_17 = arith.constant 0 : index
    %53 = vector.load %arg3[%c0_15, %c0_16, %c0_17] : memref<4x16x16xf32, #tpu.memory_space<vmem>>, vector<4x16x16xf32>
    tpu.vector_store %arg3[%c0_15, %c0_16, %c0_17], %52 {strides = array<i32>} : memref<4x16x16xf32, #tpu.memory_space<vmem>>, vector<4x16x16xf32>,
    return
  }
  func.func @transform_0(%arg0: i32, %arg1: i32) -> (i32, i32, i32) {
    %c0_i32 = arith.constant 0 : i32
    %c0_i32_0 = arith.constant 0 : i32
    return %arg0, %arg1, %c0_i32 : i32, i32, i32
  }
  func.func @transform_1(%arg0: i32, %arg1: i32) -> (i32, i32, i32) {
    %c0_i32 = arith.constant 0 : i32
    %c0_i32_0 = arith.constant 0 : i32
    return %arg0, %arg1, %c0_i32 : i32, i32, i32
  }
}

</mosaic_0001>

<bundles_post_ra>
// kernel: tpu_custom_call.1
= control target key start
LH: loop header
LB: loop body
LE: loop exit
PB: predicated region body
PF: predicated region fallthrough
CT: control target
= control target key end

     0   :  { %6 = vsyncpa [#allocation3], 0  ;;  %s1344_s0 = inlined_call_operand.hbm [shape: f32[8,16,16], index: 0, kind: input, shape index: {}]   ;;  %s1345_s1 = inlined_call_operand.hbm [shape: f32[8,16,16], index: 1, kind: output, shape index: {}]  }
   0x1   :  { %8 = vsyncpa [#allocation3 + $0x1], 0 }
   0x2   :  { %9 = vsyncpa [#allocation4], 0 }
   0x3   :  { %11 = vsyncpa [#allocation4 + $0x1], 0  ;;  %s978_s6 = smov 0   ;;  %s980_s7 = smov 0  }
   0x4   :  { %s982_s8 = smov 0   ;;  %s984_s9 = smov 0  }
   0x5   :  { %s986_s10 = smov 0   ;;  %s988_s11 = smov 0  }
   0x6 LB: > { %s745_s12 = sadd.s32 4294967295, %s956_s11   ;;  %s746_s13 = sadd.s32 4294967294, %s956_s11   ;;  %s956_s11 = sphi %s988_s11, %s17_s11   ;;  %s952_s10 = sphi %s986_s10, %s1354_s10   ;;  %s948_s9 = sphi %s984_s9, %s1353_s9   ;;  %s944_s8 = sphi %s982_s8, %s1352_s8   ;;  %s940_s7 = sphi %s980_s7, %s1351_s7   ;;  %s936_s6 = sphi %s978_s6, %s1350_s6  }
   0x7   : > { %s29_s14 = sadd.s32 1, %s952_s10  ;;  %s38_s15 = sadd.s32 1, %s944_s8 }
   0x8   : > { %p31_p0 = scmp.ge.s32.totalorder %s29_s14, 2  ;;  %p45_p1 = scmp.ne.s32.totalorder %s944_s8, %s940_s7 }
   0x9   : > { %p46_p2 = scmp.eq.s32.totalorder %s956_s11, 0  ;;  %p51_p3 = scmp.ne.s32.totalorder %s940_s7, %s936_s6 }
   0xa   : > { %s1356_s14 = smov (%p31_p0, %s29_s14), 0  ;;  %p52_p5 = scmp.eq.s32.totalorder %s745_s12, 0 }
   0xb   : > { %p1019_p4 = por %p46_p2, %p45_p1  ;;  %s33_s17 = ssub.s32 %s952_s10, %s1356_s14 }
   0xc   : > { %p77_p6 = scmp.eq.s32.totalorder %s745_s12, 1  ;;  %p36_p7 = scmp.eq.s32.totalorder %s33_s17, 0 }
   0xd   : > { %p1025_p8 = por %p52_p5, %p51_p3  ;;  %p83_p10 = scmp.eq.s32.totalorder %s746_s13, 1 }
   0xe   : > { %p1029_p9 = por %p77_p6, %p45_p1  ;;  %p748_p12 = scmp.ge.s32.totalorder %s956_s11, 2 }
   0xf   : > { %s1034_s20 = scalar_select %p36_p7, %s944_s8, %s38_s15  }
  0x10   : > { %p1036_p11 = por %p83_p10, %p51_p3  ;;  %p778_p13 = scmp.lt.s32.totalorder %s956_s11, 2 }
  0x11   : > { %s103_s22 = sand.u32 1, %s944_s8   ;;  %s763_s24 = sshll.u32 %s952_s10, 6 }
  0x12   : > { %s749_s23 = sshll.u32 %s103_s22, 6  ;;  %s115_s27 = scalar_lea.hbm %s1344_s0, %s763_s24 }
  0x13   : > { %s107_s28 = scalar_lea.vmem [#allocation2], %s749_s23  ;;  %s116_s30 = sshll.u32 %s115_s27, 4  ;;  %s117_s30 = int_to_ptr.hbm [resolvable:$true] %s116_s30 }
  0x14   : > { %s118_s29 = sshll.u32 %s107_s28, 4  ;;  %p771_p0 = pnand %p778_p13, %p1019_p4  ;;  %s119_s29 = int_to_ptr.vmem [resolvable:$true] %s118_s29 }
  0x15   : > { %p753_p1 = scmp.ge.s32.totalorder %s956_s11, 1  ;;  %s104_s2 = scalar_lea.sflag [#allocation3], %s103_s22 }
  0x16   : > { %s958_s3 = smov 128   ;;  %s959_s4 = smov 8  }
  0x17   : > { %773 = dma.hbm_to_vmem [thread:$0]  (!%p771_p0), %s117_s30, 1024, %s119_s29, %s104_s2, %s958_s3, %s958_s3, %s959_s4  }
  0x18   : > { %p126_p2 = scmp.lt.s32.totalorder %s956_s11, 3 }
  0x1a   : > { %p127_p3 = pnand %p753_p1, %p126_p2 }
  0x1b   : > { %s1052_s5 = sand.u32 (!%p127_p3), 1, %s940_s7  }
  0x1c   : > { %130 = sbr.rel (%p127_p3) target bundleno = 526 (0x20e), region = 24  ;;  %s754_s12 = sshll.u32 (!%p127_p3), %s1052_s5, 6 }
  0x1d   : > { %s133_s13 = scalar_lea.sflag (!%p127_p3), [#allocation3], %s1052_s5  ;;  %s1058_s15 = scalar_lea.vmem (!%p127_p3), [#allocation2], %s754_s12 }
  0x21   : > { %927 = dma.done.wait (%p1025_p8), %s133_s13, 1024  }
  0x22   : > { %929 = vsyncadd (%p1025_p8), %s133_s13, 4294966272  ;;  %v168_v0 = vlaneseq  ;;  %v960_v3 = vmov 15   ;;  %v162_v4 = vld [vmem:[%s1058_s15 + $0x10] sm:$0xff]  ;;  %v163_v5 = vld [vmem:[%s1058_s15 + $0x18] sm:$0xff]  ;;  %s961_s16 = smov 16   ;;  %vm283_vm4 = vcmask 1047680  }
  0x23   : > { %839 = vset.pattern.permute.xlu1 %v960_v3  ;;  %838 = vset.pattern.permute.xlu0 %v960_v3  ;;  %v160_v6 = vld [vmem:[%s1058_s15] sm:$0xff]  ;;  %v172_v7 = vrot.slane %v162_v4, 7  ;;  %v176_v8 = vrot.slane %v163_v5, 7  ;;  %v189_v9 = vrot.slane %v162_v4, 1  ;;  %v193_v10 = vrot.slane %v163_v5, 1  ;;  %v161_v11 = vld [vmem:[%s1058_s15 + $0x8] sm:$0xff] }
  0x24   : > { %v1065_v1 = vshrl.u32 %v168_v0, 7  ;;  %840 = vset.pattern.permute.xlu2 %v960_v3  ;;  %v216_v12 = vsub.f32 0.0, %v163_v5  ;;  %v171_v13 = vrot.slane %v160_v6, 7  ;;  %v175_v14 = vrot.slane %v161_v11, 7  ;;  %v166_v35 = vld [vmem:[%s1058_s15 + $0x30] sm:$0xff]  ;;  %v167_v36 = vld [vmem:[%s1058_s15 + $0x38] sm:$0xff] }
  0x25   : > { %v188_v17 = vrot.slane %v160_v6, 1  ;;  %v192_v18 = vrot.slane %v161_v11, 1  ;;  %v215_v22 = vsub.f32 0.0, %v161_v11  ;;  %v267_v23 = vmul.f32 2.0, %v162_v4  ;;  %v164_v60 = vld [vmem:[%s1058_s15 + $0x20] sm:$0xff]  ;;  %v165_v61 = vld [vmem:[%s1058_s15 + $0x28] sm:$0xff] }
  0x26   : > { %v1068_v2 = vadd.s32 8, %v1065_v1  ;;  %vm179_vm0 = vcmp.lt.s32.totalorder %v1065_v1, 1  ;;  %vm196_vm1 = vcmp.lt.s32.totalorder %v1065_v1, 7  ;;  %vm213_vm2 = vcmp.eq.s32.totalorder %v1065_v1, 0  ;;  %s963_s17 = smov 15   ;;  %s964_s18 = smov 14  }
  0x27   : > { %v185_v15 = vsel %vm179_vm0, %v176_v8, %v172_v7  ;;  %v198_v16 = vsel %vm196_vm1, %v189_v9, %v193_v10  ;;  %v220_v20 = vperm.slane %v216_v12, 7  ;;  %v184_v21 = vsel %vm179_vm0, %v175_v14, %v171_v13  ;;  %s965_s22 = smov 113   ;;  %s155_s23 = scalar_lea.vmem [#allocation5], %s754_s12 }
  0x28   : > { %vm240_vm3 = vcmp.eq.s32.totalorder %v1068_v2, 15  ;;  %v207_v19 = vadd.f32 %v198_v16, %v185_v15  ;;  %v197_v24 = vsel %vm196_vm1, %v188_v17, %v192_v18  ;;  %v181_v25 = vsel %vm179_vm0, %v172_v7, %v176_v8  ;;  %s765_s24 = sshll.u32 %s948_s9, 6  ;;  %s655_s28 = sshll.u32 %s155_s23, 4  ;;  %s656_s28 = int_to_ptr.vmem [resolvable:$true] %s655_s28 }
  0x29   : > { %v202_v26 = vsel %vm196_vm1, %v193_v10, %v189_v9  ;;  %v225_v27 = vsel %vm213_vm2, %v220_v20, 0.0  ;;  %v205_v28 = vadd.f32 %v197_v24, %v184_v21  ;;  %v219_v29 = vperm.slane %v215_v22, 7  ;;  %s654_s27 = scalar_lea.hbm %s1345_s1, %s765_s24  ;;  %s640_s30 = scalar_lea.sflag [#allocation4], %s1052_s5 }
  0x2a   : > { %v265_v30 = vmul.f32 2.0, %v160_v6  ;;  %v233_v31 = vadd.f32 %v225_v27, %v207_v19  ;;  %v208_v32 = vadd.f32 %v202_v26, %v181_v25  ;;  %v242_v33 = vsub.f32 0.0, %v162_v4  ;;  %s657_s29 = sshll.u32 %s654_s27, 4  ;;  %s894_s12 = scalar_lea.hbm %s1345_s1, 128  ;;  %s658_s29 = int_to_ptr.hbm [resolvable:$true] %s657_s29 }
  0x2b   : > { %v180_v34 = vsel %vm179_vm0, %v171_v13, %v175_v14  ;;  %v223_v37 = vsel %vm213_vm2, %v219_v29, 0.0  ;;  %v268_v38 = vmul.f32 2.0, %v163_v5  ;;  %v201_v39 = vsel %vm196_vm1, %v192_v18, %v188_v17  ;;  %s888_s9 = sshra.s32 %s658_s29, 4  ;;  %s889_s9 = int_to_ptr.hbm [resolvable:$true] %s888_s9 }
  0x2c   : > { %v241_v40 = vsub.f32 0.0, %v160_v6  ;;  %v1100_v41 = vadd.f32 %v267_v23, %v233_v31  ;;  %v231_v42 = vadd.f32 %v223_v37, %v205_v28  ;;  %v246_v43 = vperm.slane %v242_v33, 0  ;;  %s890_s2 = scalar_lea.hbm %s889_s9, 64  ;;  %p895_p7 = scmp.lt.s32.totalorder %s889_s9, %s1345_s1 }
  0x2d   : > { %v206_v44 = vadd.f32 %v201_v39, %v180_v34  ;;  %v174_v46 = vrot.slane %v166_v35, 7  ;;  %v178_v47 = vrot.slane %v167_v36, 7  ;;  %v191_v48 = vrot.slane %v166_v35, 1  ;;  %p891_p4 = scmp.ne.s32.totalorder %s889_s9, %s890_s2  ;;  %p896_p8 = scmp.lt.s32.totalorder %s894_s12, %s890_s2 }
  0x2e   : > { %v245_v45 = vperm.slane %v241_v40, 0  ;;  %290 = vrot.lane.b32.xlu1 %v1100_v41, %s961_s16  ;;  %v1104_v49 = vadd.f32 %v265_v30, %v231_v42  ;;  %v252_v50 = vsel %vm240_vm3, %v246_v43, 0.0  ;;  %v195_v51 = vrot.slane %v167_v36, 1 }
  0x2f   : > { %v244_v52 = vsub.f32 0.0, %v166_v35  ;;  %v260_v53 = vadd.f32 %v252_v50, %v208_v32  ;;  %v266_v55 = vmul.f32 2.0, %v161_v11  ;;  %v183_v56 = vsel %vm179_vm0, %v174_v46, %v178_v47  ;;  %p892_p5 = pnand %p891_p4, %p1029_p9  ;;  %p897_p10 = por %p896_p8, %p895_p7 }
  0x30   : > { %v250_v54 = vsel %vm240_vm3, %v245_v45, 0.0  ;;  %284 = vrot.lane.b32.xlu0 %v1104_v49, %s961_s16  ;;  %v204_v58 = vsel %vm196_vm1, %v195_v51, %v191_v48  ;;  %v187_v63 = vsel %vm179_vm0, %v178_v47, %v174_v46  ;;  %v200_v3 = vsel %vm196_vm1, %v191_v48, %v195_v51 }
  0x31   : > { %v258_v57 = vadd.f32 %v250_v54, %v206_v44  ;;  %v248_v59 = vperm.slane %v244_v52, 0  ;;  %v212_v62 = vadd.f32 %v204_v58, %v183_v56  ;;  %v218_v4 = vsub.f32 0.0, %v167_v36  ;;  %p893_p6 = pneg %p892_p5 }
  0x32   : > { %v1122_v5 = vadd.f32 %v268_v38, %v260_v53  ;;  %v173_v9 = vrot.slane %v164_v60, 7  ;;  %v177_v10 = vrot.slane %v165_v61, 7  ;;  %v211_v11 = vadd.f32 %v200_v3, %v187_v63 }
  0x33   : > { %v256_v6 = vsel %vm240_vm3, %v248_v59, 0.0  ;;  %v1126_v7 = vadd.f32 %v266_v55, %v258_v57  ;;  %v222_v8 = vperm.slane %v218_v4, 7  ;;  %v190_v12 = vrot.slane %v164_v60, 1  ;;  %p898_p13 = pnand %p897_p10, %p893_p6 }
  0x34   : > { %v194_v13 = vrot.slane %v165_v61, 1  ;;  %v217_v14 = vsub.f32 0.0, %v165_v61  ;;  %v264_v15 = vadd.f32 %v256_v6, %v212_v62  ;;  %v272_v16 = vmul.f32 2.0, %v167_v36 }
  0x35   : > { %v229_v17 = vsel %vm213_vm2, %v222_v8, 0.0  ;;  %v186_v18 = vsel %vm179_vm0, %v177_v10, %v173_v9  ;;  %v182_v21 = vsel %vm179_vm0, %v173_v9, %v177_v10  ;;  %v269_v24 = vmul.f32 2.0, %v164_v60 }
  0x36   : > { %293 = vrot.lane.b32.xlu1 %v1122_v5, %s961_s16  ;;  %v199_v19 = vsel %vm196_vm1, %v190_v12, %v194_v13  ;;  %v221_v20 = vperm.slane %v217_v14, 7  ;;  %v203_v22 = vsel %vm196_vm1, %v194_v13, %v190_v12  ;;  %v243_v25 = vsub.f32 0.0, %v164_v60 }
  0x37   : > { %v209_v23 = vadd.f32 %v199_v19, %v186_v18  ;;  %v237_v26 = vadd.f32 %v229_v17, %v211_v11  ;;  %v271_v27 = vmul.f32 2.0, %v166_v35  ;;  %v210_v30 = vadd.f32 %v203_v22, %v182_v21 }
  0x38   : > { %287 = vrot.lane.b32.xlu0 %v1126_v7, %s961_s16  ;;  %v227_v28 = vsel %vm213_vm2, %v221_v20, 0.0  ;;  %v247_v31 = vperm.slane %v243_v25, 0  ;;  %v1144_v32 = vadd.f32 %v272_v16, %v264_v15  ;;  %v270_v35 = vmul.f32 2.0, %v165_v61 }
  0x39   : > { %v235_v29 = vadd.f32 %v227_v28, %v209_v23  ;;  %v1150_v36 = vadd.f32 %v271_v27, %v237_v26  ;;  %v962_v2 = vmov 0   ;;  %v282_v55 = vand.u32 127, %v168_v0 }
  0x3a   : > { %v254_v34 = vsel %vm240_vm3, %v247_v31, 0.0  ;;  %v542_v27 = vmul.f32 2.0, %v1104_v49  ;;  %v545_v31 = vmul.f32 2.0, %v1122_v5  ;;  %vm630_vm7 = vcmask 130048  }
  0x3b   : > { %v1146_v33 = vadd.f32 %v269_v24, %v235_v29  ;;  %v262_v37 = vadd.f32 %v254_v34, %v210_v30  ;;  %vm372_vm5 = vcmp.eq.s32.totalorder %v282_v55, 0  ;;  %vm461_vm6 = vcmp.eq.s32.totalorder %v282_v55, 15 }
  0x3c   : > { %v543_v30 = vmul.f32 2.0, %v1126_v7  ;;  %v544_v34 = vmul.f32 2.0, %v1100_v41 }
  0x3d   : > { %296 = vrot.lane.b32.xlu2 %v1146_v33, %s961_s16  ;;  %v1158_v1 = vadd.f32 %v270_v35, %v262_v37  ;;  %v546_v37 = vmul.f32 2.0, %v1146_v33 }
  0x3e   : > { %305 = vrot.lane.b32.xlu1 %v1144_v32, %s961_s16 }
  0x40   : > { %302 = vrot.lane.b32.xlu0 %v1150_v36, %s961_s16 }
  0x45   : > { %299 = vrot.lane.b32.xlu2 %v1158_v1, %s961_s16 }
  0x46   : > { %380 = vperm.xlu1 %839, %v1126_v7  }
  0x48   : > { %375 = vperm.xlu0 %838, %v1104_v49  }
  0x4d   : > { %385 = vperm.xlu2 %840, %v1100_v41  }
  0x4e   : > { %390 = vperm.xlu1 %839, %v1122_v5  }
  0x50   : > { %400 = vperm.xlu0 %838, %v1158_v1  }
  0x55   : > { %395 = vperm.xlu2 %840, %v1146_v33  }
  0x56   : > { %405 = vperm.xlu1 %839, %v1150_v36  }
  0x58   : > { %843 = vset.pattern.permute.xlu0 %v962_v2 }
  0x59   : > { %471 = vperm.xlu0 %843, %v1100_v41  }
  0x5d   : > { %410 = vperm.xlu2 %840, %v1144_v32  }
  0x5e   : > { %841 = vset.pattern.permute.xlu1 %v962_v2 }
  0x5f   : > { %463 = vperm.xlu1 %841, %v1104_v49  }
  0x61   : > { %491 = vperm.xlu0 %843, %v1144_v32  }
  0x65   : > { %842 = vset.pattern.permute.xlu2 %v962_v2 }
  0x66   : > { %467 = vperm.xlu2 %842, %v1126_v7  }
  0x67   : > { %475 = vperm.xlu1 %841, %v1122_v5  }
  0x6e   : > { %479 = vperm.xlu2 %842, %v1146_v33  }
  0x6f   : > { %483 = vperm.xlu1 %841, %v1158_v1  }
  0x76   : > { %487 = vperm.xlu2 %842, %v1150_v36  }
  0x97   : > { %v297_v38 = vpop.permute.xlu2 %296 }
  0x98   : > { %v298_v53 = vsel %vm283_vm4, %v297_v38, %v1146_v33 }
  0x9f   : > { %v300_v44 = vpop.permute.xlu2 %299 }
  0xa0   : > { %v291_v39 = vpop.permute.xlu1 %290  ;;  %v301_v45 = vsel %vm283_vm4, %v300_v44, %v1158_v1  ;;  %v548_v44 = vmul.f32 2.0, %v1150_v36 }
  0xa1   : > { %v292_v40 = vsel %vm283_vm4, %v291_v39, %v1100_v41 }
  0xa2   : > { %v285_v42 = vpop.permute.xlu0 %284  ;;  %312 = vrot.lane.b32.xlu1 %v292_v40, %s961_s16 }
  0xa3   : > { %v286_v43 = vsel %vm283_vm4, %v285_v42, %v1104_v49 }
  0xa4   : > { %308 = vrot.lane.b32.xlu2 %v286_v43, %s961_s16 }
  0xa7   : > { %v386_v51 = vpop.permute.xlu2 %385 }
  0xa8   : > { %v294_v46 = vpop.permute.xlu1 %293  ;;  %v415_v60 = vsel %vm372_vm5, %v386_v51, 0.0 }
  0xa9   : > { %v295_v47 = vsel %vm283_vm4, %v294_v46, %v1122_v5 }
  0xaa   : > { %v288_v48 = vpop.permute.xlu0 %287  ;;  %318 = vrot.lane.b32.xlu1 %v301_v45, %s961_s16 }
  0xab   : > { %v289_v50 = vsel %vm283_vm4, %v288_v48, %v1126_v7 }
  0xac   : > { %314 = vrot.lane.b32.xlu2 %v295_v47, %s961_s16  ;;  %310 = vrot.lane.b32.xlu0 %v289_v50, %s961_s16 }
  0xaf   : > { %v396_v61 = vpop.permute.xlu2 %395 }
  0xb0   : > { %v306_v52 = vpop.permute.xlu1 %305  ;;  %v417_v62 = vsel %vm372_vm5, %v396_v61, 0.0 }
  0xb1   : > { %v307_v59 = vsel %vm283_vm4, %v306_v52, %v1144_v32 }
  0xb2   : > { %v303_v54 = vpop.permute.xlu0 %302 }
  0xb3   : > { %v304_v56 = vsel %vm283_vm4, %v303_v54, %v1150_v36 }
  0xb4   : > { %316 = vrot.lane.b32.xlu0 %v298_v53, %s961_s16  ;;  %320 = vrot.lane.b32.xlu2 %v304_v56, %s961_s16  ;;  %v549_v53 = vmul.f32 2.0, %v1144_v32 }
  0xb7   : > { %v411_v6 = vpop.permute.xlu2 %410 }
  0xb8   : > { %v381_v57 = vpop.permute.xlu1 %380  ;;  %v420_v9 = vsel %vm372_vm5, %v411_v6, 0.0 }
  0xb9   : > { %v414_v58 = vsel %vm372_vm5, %v381_v57, 0.0 }
  0xba   : > { %431 = vrot.lane.b32.xlu1 %v414_v58, %s963_s17  ;;  %v376_v0 = vpop.permute.xlu0 %375 }
  0xbb   : > { %v413_v3 = vsel %vm372_vm5, %v376_v0, 0.0 }
  0xbc   : > { %322 = vrot.lane.b32.xlu0 %v307_v59, %s961_s16  ;;  %433 = vrot.lane.b32.xlu2 %v415_v60, %s963_s17 }
  0xc0   : > { %v391_v63 = vpop.permute.xlu1 %390  ;;  %v468_v12 = vpop.permute.xlu2 %467 }
  0xc1   : > { %v416_v11 = vsel %vm372_vm5, %v391_v63, 0.0  ;;  %v495_v19 = vsel %vm461_vm6, %v468_v12, 0.0 }
  0xc2   : > { %437 = vrot.lane.b32.xlu1 %v417_v62, %s963_s17  ;;  %v401_v4 = vpop.permute.xlu0 %400 }
  0xc3   : > { %v418_v8 = vsel %vm372_vm5, %v401_v4, 0.0 }
  0xc4   : > { %429 = vrot.lane.b32.xlu0 %v413_v3, %s963_s17  ;;  %439 = vrot.lane.b32.xlu2 %v418_v8, %s963_s17 }
  0xc8   : > { %v406_v10 = vpop.permute.xlu1 %405  ;;  %v480_v18 = vpop.permute.xlu2 %479 }
  0xc9   : > { %v419_v17 = vsel %vm372_vm5, %v406_v10, 0.0  ;;  %v498_v24 = vsel %vm461_vm6, %v480_v18, 0.0 }
  0xca   : > { %443 = vrot.lane.b32.xlu1 %v420_v9, %s963_s17 }
  0xcb   : > { %v472_v13 = vpop.permute.xlu0 %471 }
  0xcc   : > { %435 = vrot.lane.b32.xlu0 %v416_v11, %s963_s17  ;;  %v496_v14 = vsel %vm461_vm6, %v472_v13, 0.0 }
  0xd0   : > { %v488_v22 = vpop.permute.xlu2 %487 }
  0xd1   : > { %v464_v15 = vpop.permute.xlu1 %463  ;;  %v500_v23 = vsel %vm461_vm6, %v488_v22, 0.0 }
  0xd2   : > { %v494_v16 = vsel %vm461_vm6, %v464_v15, 0.0  ;;  %514 = vrot.lane.b32.xlu1 %v496_v14, %s963_s17 }
  0xd3   : > { %510 = vrot.lane.b32.xlu2 %v494_v16, %s963_s17  ;;  %v492_v28 = vpop.permute.xlu0 %491 }
  0xd4   : > { %441 = vrot.lane.b32.xlu0 %v419_v17, %s963_s17  ;;  %v501_v29 = vsel %vm461_vm6, %v492_v28, 0.0 }
  0xd9   : > { %v476_v20 = vpop.permute.xlu1 %475 }
  0xda   : > { %v497_v21 = vsel %vm461_vm6, %v476_v20, 0.0 }
  0xdb   : > { %516 = vrot.lane.b32.xlu2 %v497_v21, %s963_s17 }
  0xdc   : > { %512 = vrot.lane.b32.xlu0 %v495_v19, %s963_s17 }
  0xe1   : > { %v484_v25 = vpop.permute.xlu1 %483 }
  0xe2   : > { %v499_v26 = vsel %vm461_vm6, %v484_v25, 0.0 }
  0xe3   : > { %520 = vrot.lane.b32.xlu1 %v499_v26, %s963_s17  ;;  %522 = vrot.lane.b32.xlu2 %v500_v23, %s963_s17 }
  0xe4   : > { %518 = vrot.lane.b32.xlu0 %v498_v24, %s963_s17 }
  0xeb   : > { %558 = vrot.lane.b32.xlu1 %v542_v27, %s963_s17  ;;  %560 = vrot.lane.b32.xlu2 %v543_v30, %s963_s17 }
  0xec   : > { %524 = vrot.lane.b32.xlu0 %v501_v29, %s963_s17 }
  0xf3   : > { %564 = vrot.lane.b32.xlu1 %v545_v31, %s963_s17  ;;  %566 = vrot.lane.b32.xlu2 %v546_v37, %s963_s17 }
  0xf4   : > { %562 = vrot.lane.b32.xlu0 %v544_v34, %s963_s17 }
  0xfe   : > { %v309_v35 = vpop.permute.xlu2 %308 }
  0xff   : > { %v324_v2 = vsel %vm283_vm4, %v309_v35, %v1104_v49 }
 0x100   : > { %340 = vrot.lane.b32.xlu1 %v324_v2, %s964_s18 }
 0x106   : > { %v315_v38 = vpop.permute.xlu2 %314 }
 0x107   : > { %v327_v39 = vsel %vm283_vm4, %v315_v38, %v1122_v5 }
 0x108   : > { %346 = vrot.lane.b32.xlu1 %v327_v39, %s964_s18 }
 0x10e   : > { %v321_v40 = vpop.permute.xlu2 %320 }
 0x10f   : > { %v1251_v42 = vsel %vm283_vm4, %v321_v40, %v1150_v36  ;;  %v547_v36 = vmul.f32 2.0, %v1158_v1 }
 0x110   : > { %352 = vrot.lane.b32.xlu1 %v1251_v42, %s964_s18 }
 0x114   : > { %v313_v43 = vpop.permute.xlu1 %312 }
 0x115   : > { %v1257_v49 = vsel %vm283_vm4, %v313_v43, %v1100_v41 }
 0x116   : > { %344 = vrot.lane.b32.xlu0 %v1257_v49, %s964_s18  ;;  %v434_v54 = vpop.permute.xlu2 %433 }
 0x118   : > { %570 = vrot.lane.b32.xlu1 %v548_v44, %s963_s17 }
 0x11c   : > { %v319_v5 = vpop.permute.xlu1 %318 }
 0x11d   : > { %v1263_v45 = vsel %vm283_vm4, %v319_v5, %v1158_v1 }
 0x11e   : > { %v311_v46 = vpop.permute.xlu0 %310  ;;  %350 = vrot.lane.b32.xlu0 %v1263_v45, %s964_s18  ;;  %v1276_v1 = vpop.permute.xlu2 %439 }
 0x11f   : > { %v325_v47 = vsel %vm283_vm4, %v311_v46, %v1126_v7 }
 0x120   : > { %342 = vrot.lane.b32.xlu2 %v325_v47, %s964_s18 }
 0x126   : > { %v317_v41 = vpop.permute.xlu0 %316  ;;  %568 = vrot.lane.b32.xlu0 %v547_v36, %s963_s17 }
 0x127   : > { %v328_v48 = vsel %vm283_vm4, %v317_v41, %v1146_v33 }
 0x128   : > { %348 = vrot.lane.b32.xlu2 %v328_v48, %s964_s18 }
 0x12c   : > { %v432_v52 = vpop.permute.xlu1 %431 }
 0x12d   : > { %v511_v57 = vpop.permute.xlu2 %510 }
 0x12e   : > { %v323_v50 = vpop.permute.xlu0 %322 }
 0x12f   : > { %v331_v51 = vsel %vm283_vm4, %v323_v50, %v1144_v32 }
 0x130   : > { %354 = vrot.lane.b32.xlu2 %v331_v51, %s964_s18 }
 0x134   : > { %v438_v7 = vpop.permute.xlu1 %437 }
 0x135   : > { %v517_v59 = vpop.permute.xlu2 %516 }
 0x136   : > { %v430_v55 = vpop.permute.xlu0 %429 }
 0x138   : > { %572 = vrot.lane.b32.xlu2 %v549_v53, %s963_s17 }
 0x13c   : > { %v1278_v56 = vpop.permute.xlu1 %443 }
 0x13d   : > { %v523_v0 = vpop.permute.xlu2 %522 }
 0x13e   : > { %v436_v58 = vpop.permute.xlu0 %435 }
 0x144   : > { %v515_v33 = vpop.permute.xlu1 %514 }
 0x145   : > { %v561_v32 = vpop.permute.xlu2 %560 }
 0x146   : > { %v442_v61 = vpop.permute.xlu0 %441 }
 0x14d   : > { %v567_v6 = vpop.permute.xlu2 %566 }
 0x14e   : > { %v513_v63 = vpop.permute.xlu0 %512 }
 0x155   : > { %v1280_v60 = vpop.permute.xlu1 %520 }
 0x156   : > { %v519_v4 = vpop.permute.xlu0 %518 }
 0x15d   : > { %v559_v62 = vpop.permute.xlu1 %558 }
 0x15e   : > { %v525_v11 = vpop.permute.xlu0 %524 }
 0x165   : > { %v565_v3 = vpop.permute.xlu1 %564 }
 0x166   : > { %v563_v21 = vpop.permute.xlu0 %562 }
 0x172   : > { %v341_v8 = vpop.permute.xlu1 %340 }
 0x173   : > { %v364_v9 = vadd.f32 %v341_v8, %v324_v2 }
 0x175   : > { %v453_v10 = vsub.f32 %v364_v9, %v430_v55 }
 0x177   : > { %v534_v12 = vsub.f32 %v453_v10, %v511_v57 }
 0x179   : > { %v582_v13 = vadd.f32 %v559_v62, %v534_v12 }
 0x17a   : > { %v347_v14 = vpop.permute.xlu1 %346  ;;  %v343_v15 = vpop.permute.xlu2 %342 }
 0x17b   : > { %v367_v16 = vadd.f32 %v347_v14, %v327_v39  ;;  %v365_v17 = vadd.f32 %v343_v15, %v325_v47  ;;  %v590_v18 = vmul.f32 0.0625, %v582_v13 }
 0x17d   : > { %v456_v19 = vsub.f32 %v367_v16, %v436_v58  ;;  %v454_v20 = vsub.f32 %v365_v17, %v432_v52  ;;  %606 = vrot.lane.b32.xlu0 %v590_v18, %s965_s22 }
 0x17f   : > { %v537_v22 = vsub.f32 %v456_v19, %v517_v59  ;;  %v535_v23 = vsub.f32 %v454_v20, %v513_v63 }
 0x181   : > { %v585_v24 = vadd.f32 %v565_v3, %v537_v22  ;;  %v583_v25 = vadd.f32 %v561_v32, %v535_v23 }
 0x182   : > { %v353_v26 = vpop.permute.xlu1 %352  ;;  %v349_v27 = vpop.permute.xlu2 %348 }
 0x183   : > { %v370_v28 = vadd.f32 %v353_v26, %v1251_v42  ;;  %v368_v29 = vadd.f32 %v349_v27, %v328_v48  ;;  %v593_v30 = vmul.f32 0.0625, %v585_v24  ;;  %v591_v31 = vmul.f32 0.0625, %v583_v25 }
 0x185   : > { %v459_v34 = vsub.f32 %v370_v28, %v442_v61  ;;  %v457_v37 = vsub.f32 %v368_v29, %v438_v7  ;;  %612 = vrot.lane.b32.xlu0 %v593_v30, %s965_s22  ;;  %608 = vrot.lane.b32.xlu1 %v591_v31, %s965_s22 }
 0x187   : > { %v538_v35 = vsub.f32 %v457_v37, %v519_v4  ;;  %v540_v38 = vsub.f32 %v459_v34, %v523_v0 }
 0x188   : > { %v345_v2 = vpop.permute.xlu0 %344 }
 0x189   : > { %v366_v39 = vadd.f32 %v345_v2, %v1257_v49  ;;  %v586_v40 = vadd.f32 %v567_v6, %v538_v35 }
 0x18a   : > { %v571_v43 = vpop.permute.xlu1 %570  ;;  %v355_v44 = vpop.permute.xlu2 %354 }
 0x18b   : > { %v588_v5 = vadd.f32 %v571_v43, %v540_v38  ;;  %v455_v46 = vsub.f32 %v366_v39, %v434_v54  ;;  %v371_v42 = vadd.f32 %v355_v44, %v331_v51  ;;  %v594_v47 = vmul.f32 0.0625, %v586_v40 }
 0x18d   : > { %v596_v36 = vmul.f32 0.0625, %v588_v5  ;;  %v536_v41 = vsub.f32 %v455_v46, %v515_v33  ;;  %v460_v48 = vsub.f32 %v371_v42, %v1278_v56  ;;  %614 = vrot.lane.b32.xlu1 %v594_v47, %s965_s22 }
 0x18f   : > { %618 = vrot.lane.b32.xlu0 %v596_v36, %s965_s22  ;;  %v584_v50 = vadd.f32 %v563_v21, %v536_v41  ;;  %v541_v49 = vsub.f32 %v460_v48, %v525_v11 }
 0x190   : > { %v351_v52 = vpop.permute.xlu0 %350 }
 0x191   : > { %v369_v53 = vadd.f32 %v351_v52, %v1263_v45  ;;  %v592_v7 = vmul.f32 0.0625, %v584_v50 }
 0x192   : > { %v573_v55 = vpop.permute.xlu2 %572 }
 0x193   : > { %v458_v54 = vsub.f32 %v369_v53, %v1276_v1  ;;  %v589_v51 = vadd.f32 %v573_v55, %v541_v49  ;;  %610 = vrot.lane.b32.xlu2 %v592_v7, %s965_s22 }
 0x195   : > { %v597_v57 = vmul.f32 0.0625, %v589_v51  ;;  %v539_v56 = vsub.f32 %v458_v54, %v1280_v60 }
 0x197   : > { %620 = vrot.lane.b32.xlu1 %v597_v57, %s965_s22 }
 0x198   : > { %v569_v33 = vpop.permute.xlu0 %568 }
 0x199   : > { %v587_v58 = vadd.f32 %v569_v33, %v539_v56 }
 0x19b   : > { %v595_v59 = vmul.f32 0.0625, %v587_v58 }
 0x19d   : > { %616 = vrot.lane.b32.xlu2 %v595_v59, %s965_s22 }
 0x1ed   : > { %v611_v45 = vpop.permute.xlu2 %610 }
 0x1ee   : > { %633 = vst.msk [vmem:[%s155_s23 + $0x10] sm:$0xff] %vm630_vm7, %v611_v45 }
 0x1ef   : > { %v607_v1 = vpop.permute.xlu0 %606 }
 0x1f0   : > { %631 = vst.msk [vmem:[%s155_s23] sm:$0xff] %vm630_vm7, %v607_v1 }
 0x1f7   : > { %v613_v61 = vpop.permute.xlu0 %612  ;;  %v609_v0 = vpop.permute.xlu1 %608 }
 0x1f8   : > { %634 = vst.msk [vmem:[%s155_s23 + $0x18] sm:$0xff] %vm630_vm7, %v613_v61  ;;  %v617_v60 = vpop.permute.xlu2 %616 }
 0x1f9   : > { %632 = vst.msk [vmem:[%s155_s23 + $0x8] sm:$0xff] %vm630_vm7, %v609_v0 }
 0x1fa   : > { %636 = vst.msk [vmem:[%s155_s23 + $0x28] sm:$0xff] %vm630_vm7, %v617_v60 }
 0x1ff   : > { %v615_v62 = vpop.permute.xlu1 %614 }
 0x200   : > { %635 = vst.msk [vmem:[%s155_s23 + $0x20] sm:$0xff] %vm630_vm7, %v615_v62 }
 0x201   : > { %v619_v63 = vpop.permute.xlu0 %618 }
 0x202   : > { %637 = vst.msk [vmem:[%s155_s23 + $0x30] sm:$0xff] %vm630_vm7, %v619_v63 }
 0x209   : > { %v621_v32 = vpop.permute.xlu1 %620 }
 0x20a   : > { %638 = vst.msk [vmem:[%s155_s23 + $0x38] sm:$0xff] %vm630_vm7, %v621_v32 }
 0x20b   : > { %901 = shalt.err (!%p898_p13)
}
 0x20c   : > { %s966_s5 = smov 128   ;;  %s967_s16 = smov 8  }
 0x20d   : > { %768 = dma.vmem_to_hbm [thread:$0]  (%p1029_p9), %s656_s28, 1024, %s658_s29, %s640_s30, %s966_s5, %s966_s5, %s967_s16  }
 0x20e PF: > { %s672_s17 = sand.u32 1, %s936_s6   ;;  %p775_p0 = pnand %p748_p12, %p1036_p11 }
 0x20f   : > { %s673_s18 = scalar_lea.sflag [#allocation4], %s672_s17 }
 0x210   : > { %p776_p1 = pneg %p775_p0 }
 0x212   : > { %931 = dma.done.wait (%p776_p1), %s673_s18, 1024  }
 0x213   : > { %933 = vsyncadd (%p776_p1), %s673_s18, 4294966272  ;;  %s17_s11 = sadd.s32 1, %s956_s11   ;;  %s1350_s6 = smov %s940_s7 }
 0x214   : > { %p14_p2 = scmp.ge.s32.totalorder %s17_s11, 4   ;;  %s1351_s7 = smov %s944_s8 }
 0x215   : > { %s1352_s8 = smov %s1034_s20  ;;  %s1353_s9 = smov %s952_s10 }
 0x216   : > { %s1354_s10 = smov %s1356_s14  ;;  %16 = sbr.rel (!%p14_p2) target bundleno = 6 (0x6), region = 69 }
 0x21b   :  { %679 = vsyncpa [#allocation3], 1 }
 0x21c   :  { %681 = vsyncpa [#allocation3 + $0x1], 1 }
 0x21d   :  { %682 = vsyncpa [#allocation4], 1 }
 0x21e   :  { %684 = vsyncpa [#allocation4 + $0x1], 1 }

</bundles_post_ra>
